<compile_context>
chip_gen: v6e
topology: v6e:2x2x1
jax: 0.10.0
libtpu: 0.0.40
codegen_flags: <defaults>
</compile_context>

<pallas_src>
import functools

import jax
import jax.numpy as jnp
from jax import lax
from jax.experimental import pallas as pl
from jax.experimental.pallas import tpu as pltpu


# ----------------------------------------------------------------------------
# Fused kernel: per-(batch, head) qkv projection + masked attention + fused
# per-head slice of the output projection accumulated into the output block.
# grid = (B, H), H axis is the accumulation ("arbitrary") axis.
# ----------------------------------------------------------------------------
def _attn_head_kernel(x_ref, mask_ref, wqkv_ref, wproj_ref, bproj_ref,
                      out_ref, attn_ref, *, scale, head_dim,
                      use_q, use_k, use_v):
    hd = head_dim
    h = pl.program_id(1)

    xb = x_ref[0]                                            # (N, C) bf16

    # Per-head qkv projection: (N, C) @ (C, 3*hd) -> (N, 3*hd), f32 accum.
    qkv = jnp.dot(xb, wqkv_ref[0], preferred_element_type=jnp.float32)

    m = mask_ref[0, 0]                                       # (N, 1) f32
    if use_q and use_k and use_v:
        # One lane-dense multiply over the whole per-head slab.
        qkv = qkv * m

    q = qkv[:, 0 * hd:1 * hd]                                # (N, hd) f32
    k = qkv[:, 1 * hd:2 * hd]
    v = qkv[:, 2 * hd:3 * hd]

    if not (use_q and use_k and use_v):
        if use_q:
            q = q * m
        if use_k:
            k = k * m
        if use_v:
            v = v * m

    # Fold the softmax scale into q (N*hd elements instead of N*N scores).
    q = q * scale

    # Scores (N, N): contract last dims directly (no k transpose copy).
    s = lax.dot_general(
        q.astype(jnp.bfloat16), k.astype(jnp.bfloat16),
        dimension_numbers=(((1,), (1,)), ((), ())),
        preferred_element_type=jnp.float32)

    # Numerically-stable softmax (clamp to finfo range is redundant here).
    s = s - jnp.max(s, axis=-1, keepdims=True)
    e = jnp.exp(s)
    p = e * pl.reciprocal(jnp.sum(e, axis=-1, keepdims=True), approx=True)

    attn_ref[0, 0] = p.astype(attn_ref.dtype)

    # attn @ v -> (N, hd), then this head's slice of the output projection:
    # out += o_h @ W_proj[h*hd:(h+1)*hd, :]  (lane-dense (N, C) accumulate).
    o = jnp.dot(p.astype(jnp.bfloat16), v.astype(jnp.bfloat16),
                preferred_element_type=jnp.float32)          # (N, hd)
    contrib = jnp.dot(o.astype(jnp.bfloat16), wproj_ref[0],
                      preferred_element_type=jnp.float32)    # (N, C)

    @pl.when(h == 0)
    def _():
        out_ref[0] = (contrib + bproj_ref[...]).astype(out_ref.dtype)

    @pl.when(h > 0)
    def _():
        out_ref[0] = out_ref[0] + contrib.astype(out_ref.dtype)


def _vmem_limit_bytes(N, C, hd):
    bf, f32 = 2, 4
    blocks = (2 * N * C * bf            # x block (double-buffered)
              + 2 * N * f32             # mask block
              + 2 * C * 3 * hd * bf     # W_qkv head block
              + 2 * hd * C * bf         # W_proj head block
              + 2 * C * f32             # bias
              + 2 * N * C * f32         # output block (accumulator)
              + 2 * N * N * f32)        # attn block
    interm = (N * 3 * hd + 4 * N * N + 2 * N * hd + 2 * N * C) * f32
    return max(16 << 20, int(1.2 * (blocks + interm)))


# ----------------------------------------------------------------------------
# Wrapper
# ----------------------------------------------------------------------------
def attention_stdc_forward(x, actv_mask, w_qkv, w_proj, b_proj,
                           *, num_heads, am_mode_str="", qk_scale=None,
                           attn_dtype=jnp.float32):
    B, N, C = x.shape
    H = num_heads
    assert C % H == 0, "dim must be divisible by num_heads"
    hd = C // H
    scale = float(qk_scale) if qk_scale is not None else float(hd) ** (-0.5)

    # 'X' mode: mask x per head-chunk of the input channels BEFORE the
    # channel-mixing qkv projection (matches torch reshape/transpose).
    if "X" in am_mode_str:
        m = jnp.transpose(actv_mask, (0, 2, 1, 3))               # (B, N, H, 1)
        m = jnp.broadcast_to(m, (B, N, H, hd)).reshape(B, N, C)
        x = x * m

    # Pre-arrange weights per head so each grid step gets lane-dense blocks.
    #   wqkv_r[h] : (C, 3*hd) with columns [q_h | k_h | v_h]
    #   wproj_r[h]: (hd, C)   == W_proj[h*hd:(h+1)*hd, :]
    wq = w_qkv[:, 0 * C:1 * C].reshape(C, H, hd)
    wk = w_qkv[:, 1 * C:2 * C].reshape(C, H, hd)
    wv = w_qkv[:, 2 * C:3 * C].reshape(C, H, hd)
    wqkv_r = jnp.stack([wq, wk, wv], axis=2)                     # (C, H, 3, hd)
    wqkv_r = wqkv_r.transpose(1, 0, 2, 3).reshape(H, C, 3 * hd)
    wproj_r = w_proj.reshape(H, hd, C)

    # bf16 MXU operands; f32 accumulation / softmax / mask / bias.
    x_bf = x.astype(jnp.bfloat16)
    wqkv_bf = wqkv_r.astype(jnp.bfloat16)
    wproj_bf = wproj_r.astype(jnp.bfloat16)
    bproj_f32 = b_proj.astype(jnp.float32).reshape(1, C)
    mask_f32 = actv_mask.astype(jnp.float32)

    kernel = functools.partial(
        _attn_head_kernel,
        scale=scale, head_dim=hd,
        use_q=("Q" in am_mode_str),
        use_k=("K" in am_mode_str),
        use_v=("V" in am_mode_str),
    )

    flops = (2 * B * N * C * (3 * C)          # qkv projection (all heads)
             + 4 * B * H * N * N * hd         # q@k^T and attn@v
             + 2 * B * N * C * C)             # output projection (all heads)
    bytes_accessed = (2 * (x_bf.size + B * wqkv_bf.size + B * wproj_bf.size)
                      + 4 * (mask_f32.size + B * H * bproj_f32.size
                             + B * N * C)
                      + jnp.dtype(attn_dtype).itemsize * B * H * N * N)

    out, attn = pl.pallas_call(
        kernel,
        out_shape=(
            jax.ShapeDtypeStruct((B, N, C), jnp.float32),
            jax.ShapeDtypeStruct((B, H, N, N), attn_dtype),
        ),
        grid=(B, H),
        in_specs=[
            pl.BlockSpec((1, N, C), lambda b, h: (b, 0, 0)),          # x
            pl.BlockSpec((1, 1, N, 1), lambda b, h: (b, h, 0, 0)),    # mask
            pl.BlockSpec((1, C, 3 * hd), lambda b, h: (h, 0, 0)),     # W_qkv[h]
            pl.BlockSpec((1, hd, C), lambda b, h: (h, 0, 0)),         # W_proj[h]
            pl.BlockSpec((1, C), lambda b, h: (0, 0)),                # b_proj
        ],
        out_specs=(
            pl.BlockSpec((1, N, C), lambda b, h: (b, 0, 0)),          # output
            pl.BlockSpec((1, 1, N, N), lambda b, h: (b, h, 0, 0)),    # attn map
        ),
        compiler_params=pltpu.CompilerParams(
            dimension_semantics=("parallel", "arbitrary"),
            vmem_limit_bytes=_vmem_limit_bytes(N, C, hd)),
        cost_estimate=pl.CostEstimate(
            flops=flops,
            transcendentals=B * H * N * N,
            bytes_accessed=int(bytes_accessed)),
    )(x_bf, mask_f32, wqkv_bf, wproj_bf, bproj_f32)

    # attn_drop / proj_drop have p=0.0 (eval) -> identity.
    return out, attn


# ----------------------------------------------------------------------------
# Pure-JAX reference (correctness check only)
# ----------------------------------------------------------------------------
def _reference(x, actv_mask, w_qkv, w_proj, b_proj, *, num_heads,
               am_mode_str="", qk_scale=None):
    B, N, C = x.shape
    H = num_heads
    hd = C // H
    scale = float(qk_scale) if qk_scale is not None else float(hd) ** (-0.5)
    if "X" in am_mode_str:
        xh = x.reshape(B, N, H, hd).transpose(0, 2, 1, 3) * actv_mask
        x = xh.transpose(0, 2, 1, 3).reshape(B, N, C)
    qkv = (x @ w_qkv).reshape(B, N, 3, H, hd).transpose(2, 0, 3, 1, 4)
    q, k, v = qkv[0], qkv[1], qkv[2]
    if "Q" in am_mode_str:
        q = q * actv_mask
    if "K" in am_mode_str:
        k = k * actv_mask
    if "V" in am_mode_str:
        v = v * actv_mask
    attn = scale * jnp.einsum("bhnd,bhmd->bhnm", q, k)
    attn = jax.nn.softmax(attn, axis=-1)
    out = jnp.einsum("bhnm,bhmd->bhnd", attn, v)
    out = out.transpose(0, 2, 1, 3).reshape(B, N, C)
    out = out @ w_proj + b_proj
    return out, attn


if __name__ == "__main__":
    # Small shapes consistent with the module (dim divisible by num_heads).
    B, N, C = 2, 8, 32
    num_heads = 8
    am_mode_str = "XQKV"   # exercise all masking branches

    key = jax.random.PRNGKey(0)
    kx, km, kw1, kw2, kb = jax.random.split(key, 5)

    x = jax.random.normal(kx, (B, N, C), dtype=jnp.float32)
    actv_mask = jax.random.uniform(km, (B, num_heads, N, 1), dtype=jnp.float32)

    # Deterministic synthetic parameters (qkv_bias=False, proj has bias).
    w_qkv = 0.05 * jax.random.normal(kw1, (C, 3 * C), dtype=jnp.float32)
    w_proj = 0.05 * jax.random.normal(kw2, (C, C), dtype=jnp.float32)
    b_proj = 0.01 * jax.random.normal(kb, (1, C), dtype=jnp.float32)

    out, attn = attention_stdc_forward(
        x, actv_mask, w_qkv, w_proj, b_proj,
        num_heads=num_heads, am_mode_str=am_mode_str)
    jax.block_until_ready((out, attn))

    out_expected, attn_expected = _reference(
        x, actv_mask, w_qkv, w_proj, b_proj,
        num_heads=num_heads, am_mode_str=am_mode_str)

    assert out.shape == (B, N, C) and attn.shape == (B, num_heads, N, N)
    assert jnp.allclose(out, out_expected, rtol=1e-2, atol=1e-2)
    assert jnp.allclose(attn.astype(jnp.float32), attn_expected,
                        rtol=1e-2, atol=1e-2)

    print("KERNEL_OK")
</pallas_src>

<mosaic_0001>
module attributes {stable_mosaic.version = 11 : i64} {
  func.func @_attn_head_kernel(%arg0: i32, %arg1: i32, %arg2: memref<1x8x32xbf16, #tpu.memory_space<vmem>>, %arg3: memref<1x1x8x1xf32, #tpu.memory_space<vmem>>, %arg4: memref<1x32x12xbf16, #tpu.memory_space<vmem>>, %arg5: memref<1x4x32xbf16, #tpu.memory_space<vmem>>, %arg6: memref<1x32xf32, #tpu.memory_space<vmem>>, %arg7: memref<1x8x32xf32, #tpu.memory_space<vmem>>, %arg8: memref<1x1x8x8xf32, #tpu.memory_space<vmem>>) attributes {dimension_semantics = [#tpu.dimension_semantics<parallel>, #tpu.dimension_semantics<arbitrary>], iteration_bounds = array<i64: 2, 8>, scalar_prefetch = 0 : i64, scratch_operands = 0 : i64, tpu.core_type = #tpu.core_type<tc>, window_params = [{transform_indices = @transform_0, window_bounds = array<i64: 1, 8, 32>}, {transform_indices = @transform_1, window_bounds = array<i64: 1, 1, 8, 1>}, {transform_indices = @transform_2, window_bounds = array<i64: 1, 32, 12>}, {transform_indices = @transform_3, window_bounds = array<i64: 1, 4, 32>}, {pipeline_mode = #tpu.pipeline_mode<synchronous>, transform_indices = @transform_4, window_bounds = array<i64: 1, 32>}, {transform_indices = @transform_5, window_bounds = array<i64: 1, 8, 32>}, {transform_indices = @transform_6, window_bounds = array<i64: 1, 1, 8, 8>}]} {
    %c0 = arith.constant 0 : index
    %c0_0 = arith.constant 0 : index
    %c0_1 = arith.constant 0 : index
    %0 = vector.load %arg2[%c0, %c0_0, %c0_1] : memref<1x8x32xbf16, #tpu.memory_space<vmem>>, vector<1x8x32xbf16>
    %1 = vector.shape_cast %0 : vector<1x8x32xbf16> to vector<8x32xbf16>
    %c0_2 = arith.constant 0 : index
    %c0_3 = arith.constant 0 : index
    %c0_4 = arith.constant 0 : index
    %2 = vector.load %arg4[%c0_2, %c0_3, %c0_4] : memref<1x32x12xbf16, #tpu.memory_space<vmem>>, vector<1x32x12xbf16>
    %3 = vector.shape_cast %2 : vector<1x32x12xbf16> to vector<32x12xbf16>
    %cst = arith.constant dense<0.000000e+00> : vector<8x12xf32>
    %4 = tpu.matmul %1, %3, %cst {dimension_numbers = #tpu.dot_dimension_numbers<[1], [0], [0], [1], [0, 0, 1, 1], [], []>} : vector<8x32xbf16>, vector<32x12xbf16>, vector<8x12xf32> -> vector<8x12xf32>
    %c0_5 = arith.constant 0 : index
    %c0_6 = arith.constant 0 : index
    %c0_7 = arith.constant 0 : index
    %c0_8 = arith.constant 0 : index
    %5 = vector.load %arg3[%c0_5, %c0_6, %c0_7, %c0_8] : memref<1x1x8x1xf32, #tpu.memory_space<vmem>>, vector<1x1x8x1xf32>
    %6 = vector.shape_cast %5 : vector<1x1x8x1xf32> to vector<8x1xf32>
    %7 = vector.broadcast %6 : vector<8x1xf32> to vector<8x12xf32>
    %8 = arith.mulf %4, %7 : vector<8x12xf32>
    %9 = vector.extract_strided_slice %8 {offsets = [0, 0], sizes = [8, 4], strides = [1, 1]} : vector<8x12xf32> to vector<8x4xf32>
    %10 = vector.extract_strided_slice %8 {offsets = [0, 4], sizes = [8, 4], strides = [1, 1]} : vector<8x12xf32> to vector<8x4xf32>
    %11 = vector.extract_strided_slice %8 {offsets = [0, 8], sizes = [8, 4], strides = [1, 1]} : vector<8x12xf32> to vector<8x4xf32>
    %cst_9 = arith.constant 5.000000e-01 : f32
    %12 = vector.broadcast %cst_9 : f32 to vector<8x4xf32>
    %13 = arith.mulf %9, %12 : vector<8x4xf32>
    %14 = arith.truncf %13 : vector<8x4xf32> to vector<8x4xbf16>
    %15 = arith.truncf %10 : vector<8x4xf32> to vector<8x4xbf16>
    %cst_10 = arith.constant dense<0.000000e+00> : vector<8x8xf32>
    %16 = tpu.matmul %14, %15, %cst_10 {dimension_numbers = #tpu.dot_dimension_numbers<[1], [1], [0], [0], [0, 0, 1, 0], [], []>} : vector<8x4xbf16>, vector<8x4xbf16>, vector<8x8xf32> -> vector<8x8xf32>
    %cst_11 = arith.constant dense<0xFF800000> : vector<8xf32>
    %17 = vector.multi_reduction <maximumf>, %16, %cst_11 [1] : vector<8x8xf32> to vector<8xf32>
    %18 = vector.shape_cast %17 : vector<8xf32> to vector<8x1xf32>
    %19 = vector.broadcast %18 : vector<8x1xf32> to vector<8x8xf32>
    %20 = arith.subf %16, %19 : vector<8x8xf32>
    %21 = math.exp %20 : vector<8x8xf32>
    %cst_12 = arith.constant dense<0.000000e+00> : vector<8xf32>
    %22 = vector.multi_reduction <add>, %21, %cst_12 [1] : vector<8x8xf32> to vector<8xf32>
    %23 = vector.shape_cast %22 : vector<8xf32> to vector<8x1xf32>
    %24 = tpu.reciprocal %23 {approx = true} : vector<8x1xf32> -> vector<8x1xf32>
    %25 = vector.broadcast %24 : vector<8x1xf32> to vector<8x8xf32>
    %26 = arith.mulf %21, %25 : vector<8x8xf32>
    %c0_13 = arith.constant 0 : index
    %c0_14 = arith.constant 0 : index
    %c0_15 = arith.constant 0 : index
    %c0_16 = arith.constant 0 : index
    %27 = vector.load %arg8[%c0_13, %c0_14, %c0_15, %c0_16] : memref<1x1x8x8xf32, #tpu.memory_space<vmem>>, vector<1x1x8x8xf32>
    %28 = vector.shape_cast %27 : vector<1x1x8x8xf32> to vector<8x8xf32>
    %29 = vector.shape_cast %26 : vector<8x8xf32> to vector<1x1x8x8xf32>
    tpu.vector_store %arg8[%c0_13, %c0_14, %c0_15, %c0_16], %29 {strides = array<i32>} : memref<1x1x8x8xf32, #tpu.memory_space<vmem>>, vector<1x1x8x8xf32>,
    %30 = arith.truncf %26 : vector<8x8xf32> to vector<8x8xbf16>
    %31 = arith.truncf %11 : vector<8x4xf32> to vector<8x4xbf16>
    %cst_17 = arith.constant dense<0.000000e+00> : vector<8x4xf32>
    %32 = tpu.matmul %30, %31, %cst_17 {dimension_numbers = #tpu.dot_dimension_numbers<[1], [0], [0], [1], [0, 0, 1, 1], [], []>} : vector<8x8xbf16>, vector<8x4xbf16>, vector<8x4xf32> -> vector<8x4xf32>
    %33 = arith.truncf %32 : vector<8x4xf32> to vector<8x4xbf16>
    %c0_18 = arith.constant 0 : index
    %c0_19 = arith.constant 0 : index
    %c0_20 = arith.constant 0 : index
    %34 = vector.load %arg5[%c0_18, %c0_19, %c0_20] : memref<1x4x32xbf16, #tpu.memory_space<vmem>>, vector<1x4x32xbf16>
    %35 = vector.shape_cast %34 : vector<1x4x32xbf16> to vector<4x32xbf16>
    %cst_21 = arith.constant dense<0.000000e+00> : vector<8x32xf32>
    %36 = tpu.matmul %33, %35, %cst_21 {dimension_numbers = #tpu.dot_dimension_numbers<[1], [0], [0], [1], [0, 0, 1, 1], [], []>} : vector<8x4xbf16>, vector<4x32xbf16>, vector<8x32xf32> -> vector<8x32xf32>
    %c0_i32 = arith.constant 0 : i32
    %37 = arith.cmpi eq, %arg1, %c0_i32 : i32
    %38 = arith.extui %37 : i1 to i32
    %c0_i32_22 = arith.constant 0 : i32
    %39 = arith.cmpi ne, %38, %c0_i32_22 : i32
    scf.if %39 {
      %c0_25 = arith.constant 0 : index
      %c0_26 = arith.constant 0 : index
      %43 = vector.load %arg6[%c0_25, %c0_26] : memref<1x32xf32, #tpu.memory_space<vmem>>, vector<1x32xf32>
      %44 = vector.broadcast %43 : vector<1x32xf32> to vector<8x32xf32>
      %45 = arith.addf %36, %44 : vector<8x32xf32>
      %c0_27 = arith.constant 0 : index
      %c0_28 = arith.constant 0 : index
      %c0_29 = arith.constant 0 : index
      %46 = vector.load %arg7[%c0_27, %c0_28, %c0_29] : memref<1x8x32xf32, #tpu.memory_space<vmem>>, vector<1x8x32xf32>
      %47 = vector.shape_cast %46 : vector<1x8x32xf32> to vector<8x32xf32>
      %48 = vector.shape_cast %45 : vector<8x32xf32> to vector<1x8x32xf32>
      tpu.vector_store %arg7[%c0_27, %c0_28, %c0_29], %48 {strides = array<i32>} : memref<1x8x32xf32, #tpu.memory_space<vmem>>, vector<1x8x32xf32>,
    } else {
    }
    %c0_i32_23 = arith.constant 0 : i32
    %40 = arith.cmpi sgt, %arg1, %c0_i32_23 : i32
    %41 = arith.extui %40 : i1 to i32
    %c0_i32_24 = arith.constant 0 : i32
    %42 = arith.cmpi ne, %41, %c0_i32_24 : i32
    scf.if %42 {
      %c0_25 = arith.constant 0 : index
      %c0_26 = arith.constant 0 : index
      %c0_27 = arith.constant 0 : index
      %43 = vector.load %arg7[%c0_25, %c0_26, %c0_27] : memref<1x8x32xf32, #tpu.memory_space<vmem>>, vector<1x8x32xf32>
      %44 = vector.shape_cast %43 : vector<1x8x32xf32> to vector<8x32xf32>
      %45 = arith.addf %44, %36 : vector<8x32xf32>
      %c0_28 = arith.constant 0 : index
      %c0_29 = arith.constant 0 : index
      %c0_30 = arith.constant 0 : index
      %46 = vector.load %arg7[%c0_28, %c0_29, %c0_30] : memref<1x8x32xf32, #tpu.memory_space<vmem>>, vector<1x8x32xf32>
      %47 = vector.shape_cast %46 : vector<1x8x32xf32> to vector<8x32xf32>
      %48 = vector.shape_cast %45 : vector<8x32xf32> to vector<1x8x32xf32>
      tpu.vector_store %arg7[%c0_28, %c0_29, %c0_30], %48 {strides = array<i32>} : memref<1x8x32xf32, #tpu.memory_space<vmem>>, vector<1x8x32xf32>,
    } else {
    }
    return
  }
  func.func @transform_0(%arg0: i32, %arg1: i32) -> (i32, i32, i32) {
    %c0_i32 = arith.constant 0 : i32
    %c0_i32_0 = arith.constant 0 : i32
    %c0_i32_1 = arith.constant 0 : i32
    return %arg0, %c0_i32, %c0_i32_0 : i32, i32, i32
  }
  func.func @transform_1(%arg0: i32, %arg1: i32) -> (i32, i32, i32, i32) {
    %c0_i32 = arith.constant 0 : i32
    %c0_i32_0 = arith.constant 0 : i32
    %c0_i32_1 = arith.constant 0 : i32
    return %arg0, %arg1, %c0_i32, %c0_i32_0 : i32, i32, i32, i32
  }
  func.func @transform_2(%arg0: i32, %arg1: i32) -> (i32, i32, i32) {
    %c0_i32 = arith.constant 0 : i32
    %c0_i32_0 = arith.constant 0 : i32
    %c0_i32_1 = arith.constant 0 : i32
    return %arg1, %c0_i32, %c0_i32_0 : i32, i32, i32
  }
  func.func @transform_3(%arg0: i32, %arg1: i32) -> (i32, i32, i32) {
    %c0_i32 = arith.constant 0 : i32
    %c0_i32_0 = arith.constant 0 : i32
    %c0_i32_1 = arith.constant 0 : i32
    return %arg1, %c0_i32, %c0_i32_0 : i32, i32, i32
  }
  func.func @transform_4(%arg0: i32, %arg1: i32) -> (i32, i32) {
    %c0_i32 = arith.constant 0 : i32
    %c0_i32_0 = arith.constant 0 : i32
    %c0_i32_1 = arith.constant 0 : i32
    return %c0_i32, %c0_i32_0 : i32, i32
  }
  func.func @transform_5(%arg0: i32, %arg1: i32) -> (i32, i32, i32) {
    %c0_i32 = arith.constant 0 : i32
    %c0_i32_0 = arith.constant 0 : i32
    %c0_i32_1 = arith.constant 0 : i32
    return %arg0, %c0_i32, %c0_i32_0 : i32, i32, i32
  }
  func.func @transform_6(%arg0: i32, %arg1: i32) -> (i32, i32, i32, i32) {
    %c0_i32 = arith.constant 0 : i32
    %c0_i32_0 = arith.constant 0 : i32
    %c0_i32_1 = arith.constant 0 : i32
    return %arg0, %arg1, %c0_i32, %c0_i32_0 : i32, i32, i32, i32
  }
}

</mosaic_0001>

<bundles_post_ra>
// kernel: tpu_custom_call.1
= control target key start
LH: loop header
LB: loop body
LE: loop exit
PB: predicated region body
PF: predicated region fallthrough
CT: control target
= control target key end

     0   :  { %12 = vsyncpa [#allocation3], 0  ;;  %s1392_s0 = inlined_call_operand.vmem [shape: bf16[2,8,32], index: 0, kind: input, shape index: {}]   ;;  %s1393_s1 = inlined_call_operand.vmem [shape: f32[2,8,8,1], index: 1, kind: input, shape index: {}]   ;;  %s1394_s2 = inlined_call_operand.vmem [shape: bf16[8,32,12], index: 2, kind: input, shape index: {}]   ;;  %s1395_s3 = inlined_call_operand.vmem [shape: bf16[8,4,32], index: 3, kind: input, shape index: {}]   ;;  %s1396_s4 = inlined_call_operand.vmem [shape: f32[1,32], index: 4, kind: input, shape index: {}]   ;;  %s1397_s5 = inlined_call_operand.hbm [shape: f32[2,8,32], index: 5, kind: output, shape index: {0}]   ;;  %s1398_s6 = inlined_call_operand.hbm [shape: f32[2,8,8,8], index: 6, kind: output, shape index: {1}]  }
   0x1   :  { %14 = vsyncpa [#allocation3 + $0x1], 0 }
   0x2   :  { %15 = vsyncpa [#allocation5], 0 }
   0x3   :  { %17 = vsyncpa [#allocation5 + $0x1], 0  ;;  %s1141_s21 = smov 0   ;;  %s1143_s22 = smov 0  }
   0x4   :  { %s1145_s23 = smov 0   ;;  %s1147_s24 = smov 0  }
   0x5   :  { %s1149_s25 = smov 0   ;;  %s1151_s26 = smov 0  }
   0x6   :  { %s1153_s27 = smov 0   ;;  %s1155_s28 = smov 0  }
   0x7   :  { %s1157_s29 = smov 0   ;;  %s1159_s30 = smov 0  }
   0x8   :  { %s1161_s7 = smov 0  }
   0x9 LB: > { %1410 = sst [smem:[#allocation8_spill]] %s1057_s21  ;;  %s774_s8 = sadd.s32 4294967295, %s1097_s7   ;;  %s1097_s7 = sphi %s1161_s7, %s23_s7   ;;  %s1093_s30 = sphi %s1159_s30, %s1442_s30   ;;  %s1089_s29 = sphi %s1157_s29, %s1441_s29   ;;  %s1085_s28 = sphi %s1155_s28, %s1440_s28   ;;  %s1081_s27 = sphi %s1153_s27, %s1439_s27   ;;  %s1077_s26 = sphi %s1151_s26, %s1438_s26   ;;  %s1073_s25 = sphi %s1149_s25, %s1446_s25   ;;  %s1069_s24 = sphi %s1147_s24, %s1445_s24   ;;  %s1065_s23 = sphi %s1145_s23, %s1436_s23   ;;  %s1061_s22 = sphi %s1143_s22, %s1444_s22   ;;  %s1057_s21 = sphi %s1141_s21, %s1443_s21  }
   0xa   : > { %1411 = sst [smem:[#allocation9_spill]] %s1065_s23  ;;  %s775_s9 = sadd.s32 4294967294, %s1097_s7  }
   0xb   : > { %1412 = sst [smem:[#allocation10_spill]] %s1069_s24  ;;  %s32_s10 = sadd.s32 1, %s1089_s29 }
   0xc   : > { %1413 = sst [smem:[#allocation11_spill]] %s1077_s26  ;;  %s35_s11 = sadd.s32 1, %s1093_s30 }
   0xd   : > { %1414 = sst [smem:[#allocation12_spill]] %s1089_s29  ;;  %p33_p0 = scmp.ge.s32.totalorder %s32_s10, 8 }
   0xe   : > { %1415 = sst [smem:[#allocation13_spill]] %s1093_s30  ;;  %s169_s12 = sadd.s32 1, %s1077_s26 }
   0xf   : > { %p179_p1 = scmp.ne.s32.totalorder %s1077_s26, %s1073_s25  ;;  %p1203_p2 = scmp.eq.s32.totalorder %s774_s8, 15 }
  0x10   : > { %s1448_s10 = smov (%p33_p0, %s32_s10), 0  ;;  %s1450_s11 = smov (!%p33_p0, %s35_s11), %s1093_s30 }
  0x11   : > { %1417 = sst [smem:[#allocation14_spill]] %s1448_s10  ;;  %p1212_p3 = por %p1203_p2, %p179_p1 }
  0x12   : > { %p185_p4 = scmp.ne.s32.totalorder %s1073_s25, %s1069_s24  ;;  %p37_p5 = scmp.ge.s32.totalorder %s1450_s11, 2 }
  0x13   : > { %p1218_p6 = scmp.eq.s32.totalorder %s775_s9, 15  ;;  %s193_s16 = ssub.s32 %s1089_s29, %s1448_s10 }
  0x14   : > { %s197_s17 = sadd.s32 1, %s1065_s23  ;;  %s1452_s11 = smov (%p37_p5, %s1450_s11), 0 }
  0x15   : > { %1420 = sst [smem:[#allocation15_spill]] %s1452_s11  ;;  %p1229_p7 = por %p1218_p6, %p185_p4 }
  0x16   : > { %p207_p8 = scmp.ne.s32.totalorder %s1065_s23, %s1061_s22  ;;  %s166_s19 = ssub.s32 %s1093_s30, %s1452_s11 }
  0x17   : > { %s1421_s18 = scalar_select %p1229_p7, 1, 0 }
  0x18   : > { %p213_p9 = scmp.ne.s32.totalorder %s1061_s22, %s1057_s21  ;;  %p167_p10 = scmp.eq.s32.totalorder %s166_s19, 0 }
  0x19   : > { %1422 = sst [smem:[#allocation16_spill]] %s1421_s18  ;;  %s194_s20 = sor.u32 %s193_s16, %s166_s19 }
  0x1a   : > { %p195_p11 = scmp.eq.s32.totalorder %s194_s20, 0  ;;  %p1241_p12 = por %p207_p8, %p1203_p2 }
  0x1b   : > { %s1246_s9 = scalar_select %p167_p10, %s1077_s26, %s169_s12  }
  0x1c   : > { %s1249_s10 = scalar_select %p195_p11, %s1065_s23, %s197_s17  }
  0x1d   : > { %1424 = sst [smem:[#allocation17_spill]] %s1246_s9  ;;  %p1253_p13 = por %p213_p9, %p1218_p6 }
  0x1e   : > { %1425 = sst [smem:[#allocation18_spill]] %s1249_s10  ;;  %p778_p0 = scmp.ge.s32.totalorder %s1097_s7, 1 }
  0x1f   : > { %s1426_s29 = scalar_select %p1253_p13, 1, 0 }
  0x20   : > { %p268_p1 = scmp.lt.s32.totalorder %s1097_s7, 17 }
  0x21   : > { %1427 = sst [smem:[#allocation19_spill]] %s1426_s29 }
  0x22   : > { %p269_p4 = pnand %p778_p0, %p268_p1 }
  0x23   : > { %s1401_s13 = sand.u32 (!%p269_p4), 1, %s1073_s25   ;;  %p325_p2 = scmp.lt.s32.totalorder (!%p269_p4), %s1081_s27, 7 }
  0x24   : > { %272 = sbr.rel (%p269_p4) target bundleno = 1338 (0x53a), region = 40  ;;  %s1263_s12 = sshll.u32 (!%p269_p4), %s1401_s13, 3 }
  0x25   : > { %p319_p5 = scmp.lt.s32.totalorder (!%p269_p4), %s1085_s28, 1  ;;  %s1102_s23 = smov (!%p269_p4), 124  }
  0x26   : > { %s1103_s21 = smov (!%p269_p4), 120   ;;  %s316_s10 = sand.u32 (!%p269_p4), 1, %s1061_s22  }
  0x27   : > { %p793_p6 = scmp.ne.s32.totalorder (!%p269_p4), %s1081_s27, 0 }
  0x29   : > { %v1099_v0 = vmov 0.0   ;;  %vm1100_vm0 = vmmov 0   ;;  %v1101_v1 = vmov 0   ;;  %s1268_s15 = scalar_select %p325_p2, %s1081_s27, 7  ;;  %vm358_vm1 = vcmask 261120  }
  0x2a   : > { %813 = vmatprep.subr.bf16.mxu0 %v1099_v0  ;;  %817 = vmatprep.mubr.msk.bf16.mxu0 %vm1100_vm0, %v1099_v0  ;;  %s320_s16 = scalar_select %p319_p5, %s1085_s28, 1  ;;  %vm415_vm2 = vcmask 31744   ;;  %vm481_vm3 = vcmask 1043456   ;;  %vm462_vm4 = vcmask 64512   ;;  %vm530_vm5 = vcmask 1041408  }
  0x2b   : > { %944 = vset.pattern.permute.xlu0 %v1101_v1  ;;  %821 = vmatprep.subr.bf16.mxu1 %v1099_v0  ;;  %s803_s17 = sshll.u32 %s1268_s15, 4 }
  0x2c   : > { %823 = vmatprep.mubr.msk.bf16.mxu1 %vm1100_vm0, %v1099_v0  ;;  %s335_s13 = scalar_lea.vmem %s1394_s2, %s803_s17  ;;  %s781_s11 = sshll.u32 %s320_s16, 2 }
  0x2d   : > { %v945_v2 = vld [vmem:[%s335_s13 + $0x8] sm:$0xff]   ;;  %s782_s30 = sshll.u32 %s320_s16, 3  ;;  %v946_v3 = vld [vmem:[%s335_s13] sm:$0xff]   ;;  %s322_s29 = scalar_lea.vmem %s1392_s0, %s781_s11 }
  0x2e   : > { %s328_s9 = sadd.s32 %s782_s30, %s1268_s15  ;;  %814 = vmatpush3.bf16.msra.mxu0 %v945_v2  ;;  %v341_v5 = vld [vmem:[%s322_s29] sm:$0xf]  ;;  %s1297_s11 = sshll.u32 %s316_s10, 3 }
  0x2f   : > { %s783_s26 = sshll.u32 %s328_s9, 3  ;;  %815 = vmatprep.subr.bf16.mxu0 %v1099_v0  ;;  %s318_s18 = scalar_lea.vmem [#allocation4], %s1297_s11 }
  0x30   : > { %s330_s24 = scalar_lea.vmem %s1393_s1, %s783_s26  ;;  %s311_s9 = scalar_lea.vmem [#allocation2], %s1263_s12 }
  0x31   : > { %v402_v4 = vld [vmem:[%s330_s24] sm:$0xff]  ;;  %s786_s24 = sshll.u32 %s1268_s15, 1 }
  0x32   : > { %405 = vperm.xlu0 %944, %v402_v4   ;;  %816 = vmatpush3.bf16.msra.mxu0 %v946_v3  ;;  %s339_s30 = scalar_lea.vmem %s1395_s3, %s786_s24 }
  0x33   : > { %827 = vmatprep.subr.bf16.mxu0 %v1099_v0  ;;  %v526_v29 = vld [vmem:[%s339_s30] sm:$0x3] }
  0x34   : > { %v532_v30 = vsel %vm530_vm5, %v526_v29, 0 }
  0x35   : > { %818 = vmatmul.mubr.msk.bf16.vlgmr.msra.gmra.mxu0 %vm358_vm1, %v341_v5 }
  0x36   : > { %829 = vmatprep.mubr.msk.bf16.mxu0 %vm1100_vm0, %v1099_v0 }
  0xad   : > { %v406_v6 = vpop.permute.xlu0 %405 }
  0xf5   : > { %v396_v7 = vpop.f32.mrf.mxu0 }
  0xf6   : > { %v408_v8 = vmul.f32 %v406_v6, %v396_v7 }
  0xf7   : > { %v819_v9 = vpop.f32.mrf.mxu0 }
  0xf8   : > { %v411_v10 = vpack.c.bf16 %v408_v8, %v408_v8  ;;  %v409_v15 = vmul.f32 0.5, %v408_v8 }
  0xf9   : > { %v399_v11 = vpop.f32.mrf.mxu0 }
  0xfa   : > { %413 = vrot.lane.b32.xlu0 %v411_v10, %s1102_s23  ;;  %v410_v18 = vpack.c.bf16 %v409_v15, %v409_v15 }
  0xfb   : > { %v820_v12 = vpop.f32.mrf.mxu0 }
  0xfe   : > { %476 = vrot.lane.b32.xlu0 %v411_v10, %s1103_s21 }
 0x16c   : > { %v414_v13 = vpop.permute.xlu0 %413 }
 0x16d   : > { %v420_v14 = vsel %vm415_vm2, %v414_v13, 0 }
 0x16e   : > { %822 = vmatpush3.bf16.xpose.msra.mxu1 %v420_v14 }
 0x16f   : > { %833 = vmatprep.subr.bf16.mxu1 %v1099_v0 }
 0x170   : > { %v477_v16 = vpop.permute.xlu0 %476 }
 0x171   : > { %v483_v17 = vsel %vm481_vm3, %v477_v16, 0 }
 0x172   : > { %828 = vmatpush3.bf16.msra.mxu0 %v483_v17 }
 0x175   : > { %824 = vmatmul.mubr.msk.bf16.vlgmr.msra.gmra.mxu1 %vm415_vm2, %v410_v18 }
 0x176   : > { %835 = vmatprep.mubr.msk.bf16.mxu1 %vm1100_vm0, %v1099_v0  ;;  %834 = vmatpush3.bf16.msra.mxu1 %v532_v30 }
 0x235   : > { %v456_v19 = vpop.f32.mrf.mxu1 }
 0x236   : > { %v463_v20 = vsel %vm462_vm4, %v456_v19, -inf }
 0x237   : > { %464 = vmax.xlane.f32.xlu1 %v463_v20  ;;  %v825_v21 = vpop.f32.mrf.mxu1 }
 0x239   : > { %v459_v22 = vpop.f32.mrf.mxu1 }
 0x23b   : > { %v826_v23 = vpop.f32.mrf.mxu1 }
 0x2c0   : > { %v465_v24 = vpop.xlane.xlu1 %464 }
 0x2c1   : > { %v466_v25 = vsub.f32 %v456_v19, %v465_v24 }
 0x2c3   : > { %v467_v26 = vmul.f32 1.442695, %v466_v25 }
 0x2c5   : > { %947 = vpow2.f32 %v467_v26 }
 0x2d2   : > { %v948_v27 = vpop.eup %947 }
 0x2d3   : > { %v469_v28 = vsel %vm462_vm4, %v948_v27, 0.0 }
 0x2d4   : > { %470 = vadd.xlane.f32.xlu1 %v469_v28 }
 0x35d   : > { %v471_v31 = vpop.xlane.xlu1 %470 }
 0x35e   : > { %949 = vrcp.f32 %v471_v31 }
 0x36b   : > { %v950_v32 = vpop.eup %949 }
 0x36c   : > { %v473_v33 = vmul.f32 %v950_v32, %v948_v27 }
 0x36e   : > { %474 = vst.msk [vmem:[%s318_s18] sm:$0xff] %vm462_vm4, %v473_v33  ;;  %v475_v34 = vpack.c.bf16 %v473_v33, %v473_v33 }
 0x370   : > { %830 = vmatmul.mubr.msk.bf16.vlgmr.msra.gmra.mxu0 %vm462_vm4, %v475_v34 }
 0x430   : > { %v519_v35 = vpop.f32.mrf.mxu0 }
 0x431   : > { %v525_v36 = vpack.c.bf16 %v519_v35, %v519_v35 }
 0x432   : > { %v831_v37 = vpop.f32.mrf.mxu0 }
 0x433   : > { %836 = vmatmul.mubr.msk.bf16.vlgmr.msra.gmra.mxu1 %vm415_vm2, %v525_v36 }
 0x434   : > { %v522_v38 = vpop.f32.mrf.mxu0 }
 0x436   : > { %v832_v39 = vpop.f32.mrf.mxu0 }
 0x4f3   : > { %v568_v40 = vpop.f32.mrf.mxu1 }
 0x4f5   : > { %v837_v41 = vpop.f32.mrf.mxu1  ;;  %577 = sbr.rel (%p793_p6) target bundleno = 1278 (0x4fe), region = 44 }
 0x4f7   : > { %v571_v42 = vpop.f32.mrf.mxu1 }
 0x4f9   : > { %v838_v43 = vpop.f32.mrf.mxu1 }
 0x4fa   : > { %v794_v44 = vld [vmem:[%s1396_s4] ss:$0 sm:$0xff] }
 0x4fb   : > { %v585_v45 = vadd.f32 %v794_v44, %v568_v40 }
 0x4fd   : > { %586 = vst.msk [vmem:[%s311_s9] sm:$0xff] %vm358_vm1, %v585_v45 }
 0x4fe PF: > { %p795_p8 = scmp.le.s32.totalorder %s1081_s27, 0 }
 0x500   : > { %590 = sbr.rel (%p795_p8) target bundleno = 1289 (0x509), region = 48 }
 0x505   : > { %v591_v46 = vld [vmem:[%s311_s9] sm:$0xff] }
 0x506   : > { %v592_v47 = vadd.f32 %v591_v46, %v568_v40 }
 0x508   : > { %593 = vst.msk [vmem:[%s311_s9] sm:$0xff] %vm358_vm1, %v592_v47 }
 0x509 PF: > { %s798_s12 = sshll.u32 %s1085_s28, 7  ;;  %s613_s20 = sshll.u32 %s311_s9, 4  ;;  %s614_s20 = int_to_ptr.vmem [resolvable:$true] %s613_s20 }
 0x50a   : > { %s611_s19 = scalar_lea.hbm %s1397_s5, %s798_s12  ;;  %s1428_s23 = sand.u32 1, %s1073_s25  }
 0x50b   : > { %s595_s21 = scalar_lea.sflag [#allocation3], %s1428_s23  ;;  %s951_s24 = scalar_lea.vmem %s614_s20, 128 }
 0x50c   : > { %p952_p9 = scmp.ne.s32.totalorder %s614_s20, %s951_s24  ;;  %s1104_s26 = smov [#allocation2]  }
 0x50d   : > { %s955_s29 = sshll.u32 %s1104_s26, 4  ;;  %s956_s29 = int_to_ptr.vmem [resolvable:$false] %s955_s29 }
 0x50e   : > { %p953_p10 = pnand %p952_p9, %p1212_p3  ;;  %s957_s30 = scalar_lea.vmem %s956_s29, 256 }
 0x50f   : > { %p958_p0 = scmp.lt.s32.totalorder %s614_s20, %s956_s29  ;;  %p959_p1 = scmp.lt.s32.totalorder %s957_s30, %s951_s24 }
 0x510   : > { %p954_p11 = pneg %p953_p10 }
 0x511   : > { %p960_p4 = por %p959_p1, %p958_p0 }
 0x513   : > { %p961_p2 = pnand %p960_p4, %p954_p11 }
 0x515   : > { %964 = shalt.err (!%p961_p2)
}
 0x516   : > { %s965_s13 = scalar_lea.hbm %s611_s19, 128  ;;  %s969_s12 = scalar_lea.hbm %s1397_s5, 256 }
 0x517   : > { %p966_p5 = scmp.ne.s32.totalorder %s611_s19, %s965_s13  ;;  %p970_p9 = scmp.lt.s32.totalorder %s611_s19, %s1397_s5 }
 0x518   : > { %p971_p10 = scmp.lt.s32.totalorder %s969_s12, %s965_s13 }
 0x519   : > { %p967_p6 = pnand %p966_p5, %p1212_p3 }
 0x51a   : > { %p972_p13 = por %p971_p10, %p970_p9 }
 0x51b   : > { %p968_p8 = pneg %p967_p6 }
 0x51d   : > { %p973_p7 = pnand %p972_p13, %p968_p8 }
 0x51f   : > { %976 = shalt.err (!%p973_p7)
}
 0x520   : > { %839 = dma.vmem_to_hbm [thread:$0]  (%p1212_p3), %s614_s20, 128, %s611_s19, %s595_s21  }
 0x521   : > { %s799_s23 = sshll.u32 %s1085_s28, 3  ;;  %s628_s24 = sshll.u32 %s318_s18, 4  ;;  %s629_s24 = int_to_ptr.vmem [resolvable:$true] %s628_s24 }
 0x522   : > { %s624_s26 = sadd.s32 %s1081_s27, %s799_s23  ;;  %s600_s15 = scalar_lea.sflag [#allocation5], %s316_s10 }
 0x523   : > { %s800_s29 = sshll.u32 %s624_s26, 7  ;;  %s977_s12 = scalar_lea.vmem %s629_s24, 128 }
 0x524   : > { %s626_s13 = scalar_lea.hbm %s1398_s6, %s800_s29  ;;  %p978_p7 = scmp.ne.s32.totalorder %s629_s24, %s977_s12 }
 0x525   : > { %s1105_s14 = smov [#allocation4]  }
 0x526   : > { %p979_p13 = pnand %p978_p7, %p1241_p12  ;;  %s981_s16 = sshll.u32 %s1105_s14, 4  ;;  %s982_s16 = int_to_ptr.vmem [resolvable:$false] %s981_s16 }
 0x527   : > { %s983_s28 = scalar_lea.vmem %s982_s16, 256  ;;  %p984_p3 = scmp.lt.s32.totalorder %s629_s24, %s982_s16 }
 0x528   : > { %p980_p11 = pneg %p979_p13  ;;  %p985_p0 = scmp.lt.s32.totalorder %s983_s28, %s977_s12 }
 0x52a   : > { %p986_p1 = por %p985_p0, %p984_p3 }
 0x52c   : > { %p987_p4 = pnand %p986_p1, %p980_p11 }
 0x52e   : > { %990 = shalt.err (!%p987_p4)
}
 0x52f   : > { %s991_s27 = scalar_lea.hbm %s626_s13, 128  ;;  %s995_s18 = scalar_lea.hbm %s1398_s6, 2048 }
 0x530   : > { %p992_p2 = scmp.ne.s32.totalorder %s626_s13, %s991_s27  ;;  %p996_p8 = scmp.lt.s32.totalorder %s626_s13, %s1398_s6 }
 0x531   : > { %p997_p9 = scmp.lt.s32.totalorder %s995_s18, %s991_s27 }
 0x532   : > { %p993_p5 = pnand %p992_p2, %p1241_p12 }
 0x533   : > { %p998_p10 = por %p997_p9, %p996_p8 }
 0x534   : > { %p994_p6 = pneg %p993_p5 }
 0x536   : > { %p999_p7 = pnand %p998_p10, %p994_p6 }
 0x538   : > { %1002 = shalt.err (!%p999_p7)
}
 0x539   : > { %840 = dma.vmem_to_hbm [thread:$0]  (%p1241_p12), %s629_s24, 128, %s626_s13, %s600_s15  }
 0x53a PF: > { %s1429_s21 = sld [smem:[#allocation10_spill]]  ;;  %p850_p13 = scmp.ge.s32.totalorder %s1097_s7, 2 }
 0x53b   : > { %s1430_s17 = sld [smem:[#allocation16_spill]] }
 0x540   : > { %s640_s23 = sand.u32 1, %s1429_s21  }
 0x541   : > { %p1431_p11 = scmp.ne.s32.totalorder %s1430_s17, 0  ;;  %s641_s26 = scalar_lea.sflag [#allocation3], %s640_s23 }
 0x543   : > { %p844_p3 = pnand %p850_p13, %p1431_p11 }
 0x545   : > { %p845_p0 = pneg %p844_p3 }
 0x547   : > { %1048 = dma.done.wait (%p845_p0), %s641_s26, 128  }
 0x548   : > { %1050 = vsyncadd (%p845_p0), %s641_s26, 4294967168  ;;  %s1432_s29 = sld [smem:[#allocation8_spill]] }
 0x549   : > { %s1433_s30 = sld [smem:[#allocation19_spill]] }
 0x54e   : > { %s649_s9 = sand.u32 1, %s1432_s29  }
 0x54f   : > { %p1434_p1 = scmp.ne.s32.totalorder %s1433_s30, 0  ;;  %s650_s8 = scalar_lea.sflag [#allocation5], %s649_s9 }
 0x551   : > { %p847_p4 = pnand %p850_p13, %p1434_p1 }
 0x553   : > { %p848_p2 = pneg %p847_p4 }
 0x555   : > { %1052 = dma.done.wait (%p848_p2), %s650_s8, 128  }
 0x556   : > { %1054 = vsyncadd (%p848_p2), %s650_s8, 4294967168  ;;  %s23_s7 = sadd.s32 1, %s1097_s7   ;;  %s1435_s24 = sld [smem:[#allocation9_spill]] }
 0x557   : > { %p20_p12 = scmp.ge.s32.totalorder %s23_s7, 18   ;;  %s1436_s23 = sld [smem:[#allocation18_spill]] }
 0x558   : > { %s1437_s13 = sld [smem:[#allocation11_spill]]  ;;  %s1443_s21 = smov %s1061_s22 }
 0x559   : > { %s1438_s26 = sld [smem:[#allocation17_spill]] }
 0x55a   : > { %s1439_s27 = sld [smem:[#allocation12_spill]]  ;;  %22 = sbr.rel (!%p20_p12) target bundleno = 9 (0x9), region = 109 }
 0x55b   : > { %s1440_s28 = sld [smem:[#allocation13_spill]] }
 0x55c   : > { %s1441_s29 = sld [smem:[#allocation14_spill]]  ;;  %s1444_s22 = smov %s1435_s24 }
 0x55d   : > { %s1442_s30 = sld [smem:[#allocation15_spill]]  ;;  %s1445_s24 = smov %s1073_s25 }
 0x55e   : > { %s1446_s25 = smov %s1437_s13 }
 0x55f   :  { %655 = vsyncpa [#allocation3], 1 }
 0x560   :  { %657 = vsyncpa [#allocation3 + $0x1], 1 }
 0x561   :  { %658 = vsyncpa [#allocation5], 1 }
 0x562   :  { %660 = vsyncpa [#allocation5 + $0x1], 1 }

</bundles_post_ra>
